<compile_context>
chip_gen: v6e
topology: v6e:2x2x1
jax: 0.10.0
libtpu: 0.0.40
codegen_flags: <defaults>
</compile_context>

<pallas_src>
import functools

import jax
import jax.numpy as jnp
from jax.experimental import pallas as pl
from jax.experimental.pallas import tpu as pltpu

HIDDEN = 768
NUM_CLASSES = 6
LANE = 128


def _round_up(x, m):
    return ((x + m - 1) // m) * m


def _vmem_capacity_bytes():
    """Trace-time VMEM capacity; conservative 64 MiB (v7x per-TC) fallback."""
    try:
        info = pltpu.get_tpu_info()
        cap = getattr(info, "vmem_capacity_bytes", None)
        if cap:
            return int(cap)
    except Exception:
        pass
    return 64 * 1024 * 1024


def _emotion_head_kernel(h_ref, w_ref, b_ref, o_ref, acc_ref,
                         *, inv_s, true_s, tile_s, masked_tail):
    # h_ref: (tB, tS, H) native dtype, w_ref: (H, C_pad) f32, b_ref: (1, C_pad) f32
    # o_ref: (tB, C_pad) f32, acc_ref: (tB, H) f32 scratch (persists across S steps)
    s = pl.program_id(1)
    ns = pl.num_programs(1)

    @pl.when(s == 0)
    def _():
        acc_ref[...] = jnp.zeros_like(acc_ref)

    if masked_tail:
        # Last S tile extends past the true sequence length; the out-of-bounds
        # rows of the VMEM block are undefined and must be masked out.
        @pl.when(s < ns - 1)
        def _():
            acc_ref[...] += jnp.sum(h_ref[...], axis=1, dtype=jnp.float32)

        @pl.when(s == ns - 1)
        def _():
            idx = jax.lax.broadcasted_iota(jnp.int32, h_ref.shape, 1)
            valid = (s * tile_s + idx) < true_s
            x = jnp.where(valid, h_ref[...].astype(jnp.float32), 0.0)
            acc_ref[...] += jnp.sum(x, axis=1)
    else:
        # Per-tile partial sum over the S axis; accumulate in f32 regardless of
        # the activation dtype (no full-slab f32 upcast through HBM).
        acc_ref[...] += jnp.sum(h_ref[...], axis=1, dtype=jnp.float32)

    @pl.when(s == ns - 1)
    def _():
        pooled = acc_ref[...] * inv_s                         # mean over the TRUE S
        logits = jnp.dot(pooled, w_ref[...],
                         preferred_element_type=jnp.float32)  # (tB, C_pad) on MXU
        o_ref[...] = (logits + b_ref[...]).astype(o_ref.dtype)


def emotion_classifier_head(last_hidden_state, fc_weight, fc_bias,
                            *, tile_b=None, max_tile_s=None):
    """last_hidden_state: (B, S, 768) (f32 or bf16); fc_weight: (C, 768); fc_bias: (C,)."""
    B, S, H = last_hidden_state.shape
    C = fc_weight.shape[0]
    assert fc_weight.shape[1] == H

    # ---- wrapper-side layout plumbing (tiny, done once) ----
    # Pad classifier lane dim C -> 128 for a lane-dense MXU N-dim and unmasked stores.
    C_pad = _round_up(max(C, 1), LANE)
    w_t = jnp.zeros((H, C_pad), jnp.float32).at[:, :C].set(
        jnp.transpose(fc_weight).astype(jnp.float32))
    b2d = jnp.zeros((1, C_pad), jnp.float32).at[0, :C].set(
        fc_bias.astype(jnp.float32))

    itemsize = jnp.dtype(last_hidden_state.dtype).itemsize

    # ---- batch tile ----
    if tile_b is None:
        tB = min(_round_up(B, 8), 128)       # grow toward MXU M dim for big B
    else:
        tB = _round_up(max(tile_b, 8), 8)
    if B >= 16:
        # Ensure >=2 B tiles so both v7x TensorCores (megacore) get work.
        tB = min(tB, _round_up(-(-B // 2), 8))

    # ---- generation-aware VMEM budget & sequence tile ----
    cap = _vmem_capacity_bytes()
    usable = max(cap - (8 << 20), 16 << 20)
    fixed = (2 * H * C_pad * 4        # classifier weight (default double-buffered)
             + 2 * C_pad * 4          # bias (default double-buffered)
             + tB * H * 4             # f32 accumulator scratch
             + 2 * tB * C_pad * 4)    # output buffers
    slab_budget = min(16 << 20, max(1 << 20, (usable - fixed) // 2))
    if max_tile_s is not None:
        slab_budget = min(slab_budget, max(1, max_tile_s) * tB * H * itemsize)

    sub = max(8, 32 // itemsize)      # dtype-aware sublane multiple: f32->8, bf16->16
    if tB * S * H * itemsize <= slab_budget:
        tS = S                        # whole sequence per step (full dim is always legal)
    else:
        rows = (slab_budget // (tB * H * itemsize)) // sub * sub
        tS = max(sub, min(rows, (S // sub) * sub if S >= sub else sub))

    num_s = -(-S // tS)
    masked_tail = (S % tS) != 0
    grid = (-(-B // tB), num_s)

    vmem_need = 2 * tB * tS * H * itemsize + fixed + (2 << 20)
    vmem_limit = int(max(min(vmem_need, cap - (2 << 20)), 4 << 20))

    cost = pl.CostEstimate(
        flops=int(B) * int(S) * H + 2 * int(B) * H * C_pad,
        transcendentals=0,
        bytes_accessed=int(B) * int(S) * H * itemsize
                       + H * C_pad * 4 + C_pad * 4 + int(B) * C_pad * 4,
    )

    out = pl.pallas_call(
        functools.partial(_emotion_head_kernel,
                          inv_s=1.0 / S, true_s=S, tile_s=tS,
                          masked_tail=masked_tail),
        out_shape=jax.ShapeDtypeStruct((B, C_pad), jnp.float32),
        grid_spec=pltpu.PrefetchScalarGridSpec(
            num_scalar_prefetch=0,
            grid=grid,
            in_specs=[
                pl.BlockSpec((tB, tS, H), lambda b, s: (b, s, 0)),
                pl.BlockSpec((H, C_pad), lambda b, s: (0, 0)),
                pl.BlockSpec((1, C_pad), lambda b, s: (0, 0)),
            ],
            out_specs=pl.BlockSpec((tB, C_pad), lambda b, s: (b, 0)),
            scratch_shapes=[pltpu.VMEM((tB, H), jnp.float32)],
        ),
        compiler_params=pltpu.CompilerParams(
            dimension_semantics=("parallel", "arbitrary"),
            vmem_limit_bytes=vmem_limit,
        ),
        cost_estimate=cost,
    )(last_hidden_state, w_t, b2d)

    return out[:, :C]


def reference_head(last_hidden_state, fc_weight, fc_bias):
    pooled = jnp.mean(last_hidden_state.astype(jnp.float32), axis=1)
    return pooled @ fc_weight.astype(jnp.float32).T + fc_bias.astype(jnp.float32)


if __name__ == "__main__":
    key = jax.random.PRNGKey(0)
    k_ids, k_hid, k_w, k_b, k_hid2, k_hid3 = jax.random.split(key, 6)

    # Small shapes consistent with the module's forward.
    B, S = 2, 8

    # These correspond to the module's (input_ids, attention_mask) arguments;
    # the opaque transformer output is synthesized deterministically from them.
    input_ids = jax.random.randint(k_ids, (B, S), 0, 30522, dtype=jnp.int32)
    attention_mask = jnp.ones((B, S), dtype=jnp.int32)
    last_hidden_state = jax.random.normal(k_hid, (B, S, HIDDEN), dtype=jnp.float32)

    # Deterministic nn.Linear(768, 6) parameters (torch layout: weight (C, H)).
    fc_weight = jax.random.normal(k_w, (NUM_CLASSES, HIDDEN), dtype=jnp.float32) * 0.02
    fc_bias = jax.random.normal(k_b, (NUM_CLASSES,), dtype=jnp.float32) * 0.02

    # --- case 1: f32 activations, single S tile, ragged B (< tB) ---
    logits = emotion_classifier_head(last_hidden_state, fc_weight, fc_bias)
    logits = jax.block_until_ready(logits)
    ref = reference_head(last_hidden_state, fc_weight, fc_bias)
    assert logits.shape == (B, NUM_CLASSES)
    assert jnp.allclose(logits, ref, atol=1e-4, rtol=1e-4), "mismatch vs reference (f32)"

    # --- case 2: bf16 activations, multi-step S streaming with a masked ragged S tail ---
    B2, S2 = 3, 40
    h_bf16 = jax.random.normal(k_hid2, (B2, S2, HIDDEN), dtype=jnp.float32).astype(jnp.bfloat16)
    logits2 = emotion_classifier_head(h_bf16, fc_weight, fc_bias, max_tile_s=16)
    logits2 = jax.block_until_ready(logits2)
    ref2 = reference_head(h_bf16, fc_weight, fc_bias)
    assert logits2.shape == (B2, NUM_CLASSES)
    assert jnp.allclose(logits2, ref2, atol=2e-2, rtol=2e-2), "mismatch vs reference (bf16)"

    # --- case 3: f32, S not a multiple of 8, single full-S tile, ragged B ---
    B3, S3 = 3, 13
    h3 = jax.random.normal(k_hid3, (B3, S3, HIDDEN), dtype=jnp.float32)
    logits3 = emotion_classifier_head(h3, fc_weight, fc_bias)
    logits3 = jax.block_until_ready(logits3)
    ref3 = reference_head(h3, fc_weight, fc_bias)
    assert logits3.shape == (B3, NUM_CLASSES)
    assert jnp.allclose(logits3, ref3, atol=1e-4, rtol=1e-4), "mismatch vs reference (odd S)"

    print("KERNEL_OK")
</pallas_src>

<mosaic_0001>
module attributes {stable_mosaic.version = 11 : i64} {
  func.func @_emotion_head_kernel(%arg0: i32, %arg1: i32, %arg2: memref<8x8x768xf32, #tpu.memory_space<vmem>>, %arg3: memref<768x128xf32, #tpu.memory_space<vmem>>, %arg4: memref<1x128xf32, #tpu.memory_space<vmem>>, %arg5: memref<8x128xf32, #tpu.memory_space<vmem>>, %arg6: memref<8x768xf32, #tpu.memory_space<vmem>>) attributes {dimension_semantics = [#tpu.dimension_semantics<parallel>, #tpu.dimension_semantics<arbitrary>], iteration_bounds = array<i64: 1, 1>, scalar_prefetch = 0 : i64, scratch_operands = 1 : i64, tpu.core_type = #tpu.core_type<tc>, window_params = [{transform_indices = @transform_0, window_bounds = array<i64: 8, 8, 768>}, {pipeline_mode = #tpu.pipeline_mode<synchronous>, transform_indices = @transform_1, window_bounds = array<i64: 768, 128>}, {pipeline_mode = #tpu.pipeline_mode<synchronous>, transform_indices = @transform_2, window_bounds = array<i64: 1, 128>}, {transform_indices = @transform_3, window_bounds = array<i64: 8, 128>}]} {
    %c0_i32 = arith.constant 0 : i32
    %0 = arith.cmpi eq, %arg1, %c0_i32 : i32
    %1 = arith.extui %0 : i1 to i32
    %c0_i32_0 = arith.constant 0 : i32
    %2 = arith.cmpi ne, %1, %c0_i32_0 : i32
    scf.if %2 {
      %cst_9 = arith.constant 0.000000e+00 : f32
      %11 = vector.broadcast %cst_9 : f32 to vector<8x768xf32>
      %c0_10 = arith.constant 0 : index
      %c0_11 = arith.constant 0 : index
      %12 = vector.load %arg6[%c0_10, %c0_11] : memref<8x768xf32, #tpu.memory_space<vmem>>, vector<8x768xf32>
      tpu.vector_store %arg6[%c0_10, %c0_11], %11 {strides = array<i32>} : memref<8x768xf32, #tpu.memory_space<vmem>>, vector<8x768xf32>,
    } else {
    }
    %c0 = arith.constant 0 : index
    %c0_1 = arith.constant 0 : index
    %3 = vector.load %arg6[%c0, %c0_1] : memref<8x768xf32, #tpu.memory_space<vmem>>, vector<8x768xf32>
    %c0_2 = arith.constant 0 : index
    %c0_3 = arith.constant 0 : index
    %c0_4 = arith.constant 0 : index
    %4 = vector.load %arg2[%c0_2, %c0_3, %c0_4] : memref<8x8x768xf32, #tpu.memory_space<vmem>>, vector<8x8x768xf32>
    %cst = arith.constant dense<0.000000e+00> : vector<8x768xf32>
    %5 = vector.multi_reduction <add>, %4, %cst [1] : vector<8x8x768xf32> to vector<8x768xf32>
    %6 = arith.addf %3, %5 : vector<8x768xf32>
    %c0_5 = arith.constant 0 : index
    %c0_6 = arith.constant 0 : index
    %7 = vector.load %arg6[%c0_5, %c0_6] : memref<8x768xf32, #tpu.memory_space<vmem>>, vector<8x768xf32>
    tpu.vector_store %arg6[%c0_5, %c0_6], %6 {strides = array<i32>} : memref<8x768xf32, #tpu.memory_space<vmem>>, vector<8x768xf32>,
    %c0_i32_7 = arith.constant 0 : i32
    %8 = arith.cmpi eq, %arg1, %c0_i32_7 : i32
    %9 = arith.extui %8 : i1 to i32
    %c0_i32_8 = arith.constant 0 : i32
    %10 = arith.cmpi ne, %9, %c0_i32_8 : i32
    scf.if %10 {
      %c0_9 = arith.constant 0 : index
      %c0_10 = arith.constant 0 : index
      %11 = vector.load %arg6[%c0_9, %c0_10] : memref<8x768xf32, #tpu.memory_space<vmem>>, vector<8x768xf32>
      %cst_11 = arith.constant 1.250000e-01 : f32
      %12 = vector.broadcast %cst_11 : f32 to vector<8x768xf32>
      %13 = arith.mulf %11, %12 : vector<8x768xf32>
      %c0_12 = arith.constant 0 : index
      %c0_13 = arith.constant 0 : index
      %14 = vector.load %arg3[%c0_12, %c0_13] : memref<768x128xf32, #tpu.memory_space<vmem>>, vector<768x128xf32>
      %cst_14 = arith.constant dense<0.000000e+00> : vector<8x128xf32>
      %15 = tpu.matmul %13, %14, %cst_14 {dimension_numbers = #tpu.dot_dimension_numbers<[1], [0], [0], [1], [0, 0, 1, 1], [], []>} : vector<8x768xf32>, vector<768x128xf32>, vector<8x128xf32> -> vector<8x128xf32>
      %c0_15 = arith.constant 0 : index
      %c0_16 = arith.constant 0 : index
      %16 = vector.load %arg4[%c0_15, %c0_16] : memref<1x128xf32, #tpu.memory_space<vmem>>, vector<1x128xf32>
      %17 = vector.broadcast %16 : vector<1x128xf32> to vector<8x128xf32>
      %18 = arith.addf %15, %17 : vector<8x128xf32>
      %c0_17 = arith.constant 0 : index
      %c0_18 = arith.constant 0 : index
      %19 = vector.load %arg5[%c0_17, %c0_18] : memref<8x128xf32, #tpu.memory_space<vmem>>, vector<8x128xf32>
      tpu.vector_store %arg5[%c0_17, %c0_18], %18 {strides = array<i32>} : memref<8x128xf32, #tpu.memory_space<vmem>>, vector<8x128xf32>,
    } else {
    }
    return
  }
  func.func @transform_0(%arg0: i32, %arg1: i32) -> (i32, i32, i32) {
    %c0_i32 = arith.constant 0 : i32
    %c0_i32_0 = arith.constant 0 : i32
    return %arg0, %arg1, %c0_i32 : i32, i32, i32
  }
  func.func @transform_1(%arg0: i32, %arg1: i32) -> (i32, i32) {
    %c0_i32 = arith.constant 0 : i32
    %c0_i32_0 = arith.constant 0 : i32
    %c0_i32_1 = arith.constant 0 : i32
    return %c0_i32, %c0_i32_0 : i32, i32
  }
  func.func @transform_2(%arg0: i32, %arg1: i32) -> (i32, i32) {
    %c0_i32 = arith.constant 0 : i32
    %c0_i32_0 = arith.constant 0 : i32
    %c0_i32_1 = arith.constant 0 : i32
    return %c0_i32, %c0_i32_0 : i32, i32
  }
  func.func @transform_3(%arg0: i32, %arg1: i32) -> (i32, i32) {
    %c0_i32 = arith.constant 0 : i32
    %c0_i32_0 = arith.constant 0 : i32
    return %arg0, %c0_i32 : i32, i32
  }
}

</mosaic_0001>

<bundles_post_ra>
// kernel: tpu_custom_call.1
= control target key start
LH: loop header
LB: loop body
LE: loop exit
PB: predicated region body
PF: predicated region fallthrough
CT: control target
= control target key end

     0   :  { %8 = vsyncpa [#allocation4], 0  ;;  %s1121_s0 = inlined_call_operand.hbm [shape: f32[2,8,768], index: 0, kind: input, shape index: {}]   ;;  %s1122_s1 = inlined_call_operand.hbm [shape: f32[768,128], index: 1, kind: input, shape index: {}]   ;;  %s1123_s2 = inlined_call_operand.vmem [shape: f32[1,128], index: 2, kind: input, shape index: {}]   ;;  %s1124_s3 = inlined_call_operand.hbm [shape: f32[2,128], index: 3, kind: output, shape index: {}]  }
   0x1   :  { %9 = vsyncpa [#allocation7], 0 }
   0x2   :  { %10 = vsyncpa [#allocation5], 0 }
   0x3   :  { %15 = vsyncadd [#allocation4], 4608  ;;  %s1038_s12 = smov [#allocation3]  }
   0x4   :  { %s16_s13 = sshll.u32 %s1038_s12, 4  ;;  %s17_s13 = int_to_ptr.vmem [resolvable:$true] %s16_s13 }
   0x5   :  { %s980_s14 = scalar_lea.vmem %s17_s13, 1536  ;;  %s984_s15 = scalar_lea.vmem %s17_s13, 6144 }
   0x6   :  { %p981_p0 = scmp.ne.s32.totalorder %s17_s13, %s980_s14  ;;  %p985_p1 = scmp.lt.s32.totalorder %s17_s13, %s17_s13 }
   0x7   :  { %p986_p2 = scmp.lt.s32.totalorder %s984_s15, %s980_s14 }
   0x9   :  { %p987_p3 = por %p986_p2, %p985_p1 }
   0xb   :  { %p988_p4 = pnand %p987_p3, %p981_p0 }
   0xd   :  { %991 = shalt.err (!%p988_p4)
}
   0xe   :  { %s1039_s16 = smov 768   ;;  %s1040_s17 = smov 48  }
   0xf   :  { %22 = dma.hbm_to_vmem [thread:$0]  %s1121_s0, 1536, %s17_s13, [#allocation4], %s1039_s16, %s1039_s16, %s1040_s17  }
  0x10   :  { %s1041_s20 = smov [#allocation6]  }
  0x11   :  { %s28_s21 = sshll.u32 %s1041_s20, 4  ;;  %s29_s21 = int_to_ptr.vmem [resolvable:$true] %s28_s21 }
  0x12   :  { %s1000_s22 = scalar_lea.vmem %s29_s21, 12288  ;;  %p1005_p6 = scmp.lt.s32.totalorder %s29_s21, %s29_s21 }
  0x13   :  { %p1001_p5 = scmp.ne.s32.totalorder %s29_s21, %s1000_s22  ;;  %p1006_p7 = scmp.lt.s32.totalorder %s1000_s22, %s1000_s22 }
  0x15   :  { %p1007_p8 = por %p1006_p7, %p1005_p6 }
  0x17   :  { %p1008_p9 = pnand %p1007_p8, %p1001_p5 }
  0x19   :  { %1011 = shalt.err (!%p1008_p9)
}
  0x1a   :  { %s1042_s23 = smov 128   ;;  %s1043_s24 = smov 8  }
  0x1b   :  { %34 = dma.hbm_to_vmem [thread:$0]  %s1122_s1, 12288, %s29_s21, [#allocation7], %s1042_s23, %s1042_s23, %s1043_s24  }
  0x1c   :  { %1032 = dma.done.wait [#allocation4], 6144  }
  0x1d   :  { %1033 = vsyncadd [#allocation4], 4294961152 }
  0x1e   :  { %1034 = dma.done.wait [#allocation7], 12288  }
  0x1f   :  { %1035 = vsyncadd [#allocation7], 4294955008  ;;  %v556_v0 = vld [vmem:[#allocation6 + $0xf8] sm:$0xff]  ;;  %v555_v2 = vld [vmem:[#allocation6 + $0xf0] sm:$0xff]  ;;  %vm443_vm0 = vcmask 1041409   ;;  %vm445_vm1 = vcmask 1042434  }
  0x20   :  { %v540_v1 = vld [vmem:[#allocation6 + $0x78] sm:$0xff]  ;;  %858 = vmatprep.subr.mxu0 %v556_v0  ;;  %v539_v4 = vld [vmem:[#allocation6 + $0x70] sm:$0xff]  ;;  %v554_v6 = vld [vmem:[#allocation6 + $0xe8] sm:$0xff]  ;;  %vm447_vm2 = vcmask 1043459   ;;  %vm449_vm3 = vcmask 1044484   ;;  %vm451_vm4 = vcmask 1045509  }
  0x21   :  { %v588_v3 = vld [vmem:[#allocation6 + $0x1f8] sm:$0xff]  ;;  %859 = vmatpush3.msra.mxu0 %v540_v1  ;;  %v587_v7 = vld [vmem:[#allocation6 + $0x1f0] sm:$0xff]  ;;  %v538_v8 = vld [vmem:[#allocation6 + $0x68] sm:$0xff]  ;;  %vm453_vm5 = vcmask 1046534   ;;  %vm455_vm6 = vcmask 1047559  }
  0x22   :  { %v572_v5 = vld [vmem:[#allocation6 + $0x178] sm:$0xff]  ;;  %893 = vmatprep.subr.mxu1 %v588_v3  ;;  %860 = vmatprep.subr.mxu0 %v555_v2  ;;  %v571_v9 = vld [vmem:[#allocation6 + $0x170] sm:$0xff]  ;;  %v586_v10 = vld [vmem:[#allocation6 + $0x1e8] sm:$0xff] }
  0x23   :  { %894 = vmatpush3.msra.mxu1 %v572_v5  ;;  %861 = vmatpush3.msra.mxu0 %v539_v4  ;;  %v553_v11 = vld [vmem:[#allocation6 + $0xe0] sm:$0xff]  ;;  %v570_v12 = vld [vmem:[#allocation6 + $0x168] sm:$0xff]  ;;  %v552_v15 = vld [vmem:[#allocation6 + $0xd8] sm:$0xff] }
  0x24   :  { %895 = vmatprep.subr.mxu1 %v587_v7  ;;  %862 = vmatprep.subr.mxu0 %v554_v6  ;;  %v537_v13 = vld [vmem:[#allocation6 + $0x60] sm:$0xff]  ;;  %v536_v17 = vld [vmem:[#allocation6 + $0x58] sm:$0xff]  ;;  %v551_v19 = vld [vmem:[#allocation6 + $0xd0] sm:$0xff] }
  0x25   :  { %896 = vmatpush3.msra.mxu1 %v571_v9  ;;  %v585_v14 = vld [vmem:[#allocation6 + $0x1e0] sm:$0xff]  ;;  %863 = vmatpush3.msra.mxu0 %v538_v8  ;;  %v584_v18 = vld [vmem:[#allocation6 + $0x1d8] sm:$0xff]  ;;  %v535_v21 = vld [vmem:[#allocation6 + $0x50] sm:$0xff] }
  0x26   :  { %897 = vmatprep.subr.mxu1 %v586_v10  ;;  %v569_v16 = vld [vmem:[#allocation6 + $0x160] sm:$0xff]  ;;  %864 = vmatprep.subr.mxu0 %v553_v11  ;;  %v568_v20 = vld [vmem:[#allocation6 + $0x158] sm:$0xff]  ;;  %v583_v22 = vld [vmem:[#allocation6 + $0x1d0] sm:$0xff] }
  0x27   :  { %898 = vmatpush3.msra.mxu1 %v570_v12  ;;  %865 = vmatpush3.msra.mxu0 %v537_v13  ;;  %v550_v23 = vld [vmem:[#allocation6 + $0xc8] sm:$0xff]  ;;  %v567_v24 = vld [vmem:[#allocation6 + $0x150] sm:$0xff]  ;;  %v549_v27 = vld [vmem:[#allocation6 + $0xc0] sm:$0xff] }
  0x28   :  { %899 = vmatprep.subr.mxu1 %v585_v14  ;;  %866 = vmatprep.subr.mxu0 %v552_v15  ;;  %v534_v25 = vld [vmem:[#allocation6 + $0x48] sm:$0xff]  ;;  %v533_v29 = vld [vmem:[#allocation6 + $0x40] sm:$0xff]  ;;  %v548_v31 = vld [vmem:[#allocation6 + $0xb8] sm:$0xff] }
  0x29   :  { %900 = vmatpush3.msra.mxu1 %v569_v16  ;;  %867 = vmatpush3.msra.mxu0 %v536_v17  ;;  %v582_v26 = vld [vmem:[#allocation6 + $0x1c8] sm:$0xff]  ;;  %v581_v30 = vld [vmem:[#allocation6 + $0x1c0] sm:$0xff]  ;;  %v532_v33 = vld [vmem:[#allocation6 + $0x38] sm:$0xff] }
  0x2a   :  { %901 = vmatprep.subr.mxu1 %v584_v18  ;;  %868 = vmatprep.subr.mxu0 %v551_v19  ;;  %v566_v28 = vld [vmem:[#allocation6 + $0x148] sm:$0xff]  ;;  %v565_v32 = vld [vmem:[#allocation6 + $0x140] sm:$0xff]  ;;  %v580_v34 = vld [vmem:[#allocation6 + $0x1b8] sm:$0xff] }
  0x2b   :  { %902 = vmatpush3.msra.mxu1 %v568_v20  ;;  %869 = vmatpush3.msra.mxu0 %v535_v21  ;;  %v547_v35 = vld [vmem:[#allocation6 + $0xb0] sm:$0xff]  ;;  %v564_v37 = vld [vmem:[#allocation6 + $0x138] sm:$0xff]  ;;  %v546_v38 = vld [vmem:[#allocation6 + $0xa8] sm:$0xff] }
  0x2c   :  { %903 = vmatprep.subr.mxu1 %v583_v22  ;;  %870 = vmatprep.subr.mxu0 %v550_v23  ;;  %v531_v36 = vld [vmem:[#allocation6 + $0x30] sm:$0xff]  ;;  %v530_v40 = vld [vmem:[#allocation6 + $0x28] sm:$0xff]  ;;  %v545_v42 = vld [vmem:[#allocation6 + $0xa0] sm:$0xff] }
  0x2d   :  { %904 = vmatpush3.msra.mxu1 %v567_v24  ;;  %871 = vmatpush3.msra.mxu0 %v534_v25  ;;  %v579_v39 = vld [vmem:[#allocation6 + $0x1b0] sm:$0xff]  ;;  %v578_v43 = vld [vmem:[#allocation6 + $0x1a8] sm:$0xff]  ;;  %v529_v44 = vld [vmem:[#allocation6 + $0x20] sm:$0xff] }
  0x2e   :  { %905 = vmatprep.subr.mxu1 %v582_v26  ;;  %872 = vmatprep.subr.mxu0 %v549_v27  ;;  %v563_v41 = vld [vmem:[#allocation6 + $0x130] sm:$0xff]  ;;  %v562_v45 = vld [vmem:[#allocation6 + $0x128] sm:$0xff]  ;;  %v577_v46 = vld [vmem:[#allocation6 + $0x1a0] sm:$0xff] }
  0x2f   :  { %906 = vmatpush3.msra.mxu1 %v566_v28  ;;  %873 = vmatpush3.msra.mxu0 %v533_v29  ;;  %v544_v47 = vld [vmem:[#allocation6 + $0x98] sm:$0xff]  ;;  %v561_v48 = vld [vmem:[#allocation6 + $0x120] sm:$0xff]  ;;  %v60_v49 = vld [vmem:[#allocation3 + $0x8] sm:$0xff] }
  0x30   :  { %907 = vmatprep.subr.mxu1 %v581_v30  ;;  %874 = vmatprep.subr.mxu0 %v548_v31  ;;  %v66_v50 = vld [vmem:[#allocation3 + $0x38] sm:$0xff]  ;;  %v72_v51 = vld [vmem:[#allocation3 + $0x68] sm:$0xff]  ;;  %v113_v54 = vrot.slane %v60_v49, 4  ;;  %v543_v4 = vld [vmem:[#allocation6 + $0x90] sm:$0xff] }
  0x31   :  { %908 = vmatpush3.msra.mxu1 %v565_v32  ;;  %875 = vmatpush3.msra.mxu0 %v532_v33  ;;  %v78_v52 = vld [vmem:[#allocation3 + $0x98] sm:$0xff]  ;;  %v84_v53 = vld [vmem:[#allocation3 + $0xc8] sm:$0xff]  ;;  %v149_v55 = vrot.slane %v66_v50, 4  ;;  %v185_v59 = vrot.slane %v72_v51, 4  ;;  %v527_v10 = vld [vmem:[#allocation6 + $0x10] sm:$0xff] }
  0x32   :  { %909 = vmatprep.subr.mxu1 %v580_v34  ;;  %876 = vmatprep.subr.mxu0 %v547_v35  ;;  %v90_v56 = vld [vmem:[#allocation3 + $0xf8] sm:$0xff]  ;;  %v96_v57 = vld [vmem:[#allocation3 + $0x128] sm:$0xff]  ;;  %v221_v60 = vrot.slane %v78_v52, 4  ;;  %v257_v61 = vrot.slane %v84_v53, 4  ;;  %v114_v0 = vadd.f32 %v113_v54, %v60_v49  ;;  %v575_v11 = vld [vmem:[#allocation6 + $0x190] sm:$0xff] }
  0x33   :  { %910 = vmatpush3.msra.mxu1 %v564_v37  ;;  %877 = vmatpush3.msra.mxu0 %v531_v36  ;;  %v102_v58 = vld [vmem:[#allocation3 + $0x158] sm:$0xff]  ;;  %v150_v1 = vadd.f32 %v149_v55, %v66_v50  ;;  %v293_v2 = vrot.slane %v90_v56, 4  ;;  %v329_v3 = vrot.slane %v96_v57, 4  ;;  %v186_v6 = vadd.f32 %v185_v59, %v72_v51  ;;  %v542_v16 = vld [vmem:[#allocation6 + $0x88] sm:$0xff]  ;;  %v559_v17 = vld [vmem:[#allocation6 + $0x110] sm:$0xff] }
  0x34   :  { %911 = vmatprep.subr.mxu1 %v579_v39  ;;  %878 = vmatprep.subr.mxu0 %v546_v38  ;;  %v528_v62 = vld [vmem:[#allocation6 + $0x18] sm:$0xff]  ;;  %v222_v7 = vadd.f32 %v221_v60, %v78_v52  ;;  %v258_v8 = vadd.f32 %v257_v61, %v84_v53  ;;  %v365_v9 = vrot.slane %v102_v58, 4  ;;  %v115_v12 = vrot.slane %v114_v0, 2  ;;  %v526_v22 = vld [vmem:[#allocation6 + $0x8] sm:$0xff]  ;;  %v541_v28 = vld [vmem:[#allocation6 + $0x80] sm:$0xff] }
  0x35   :  { %912 = vmatpush3.msra.mxu1 %v563_v41  ;;  %879 = vmatpush3.msra.mxu0 %v530_v40  ;;  %v576_v63 = vld [vmem:[#allocation6 + $0x198] sm:$0xff]  ;;  %v151_v13 = vrot.slane %v150_v1, 2  ;;  %v294_v14 = vadd.f32 %v293_v2, %v90_v56  ;;  %v330_v15 = vadd.f32 %v329_v3, %v96_v57  ;;  %v187_v18 = vrot.slane %v186_v6, 2  ;;  %v574_v23 = vld [vmem:[#allocation6 + $0x188] sm:$0xff]  ;;  %v525_v34 = vld [vmem:[#allocation6] sm:$0xff] }
  0x36   :  { %913 = vmatprep.subr.mxu1 %v578_v43  ;;  %880 = vmatprep.subr.mxu0 %v545_v42  ;;  %v560_v5 = vld [vmem:[#allocation6 + $0x118] sm:$0xff]  ;;  %v223_v19 = vrot.slane %v222_v7, 2  ;;  %v259_v20 = vrot.slane %v258_v8, 2  ;;  %v366_v21 = vadd.f32 %v365_v9, %v102_v58  ;;  %v116_v24 = vadd.f32 %v115_v12, %v114_v0  ;;  %v558_v33 = vld [vmem:[#allocation6 + $0x108] sm:$0xff]  ;;  %v573_v39 = vld [vmem:[#allocation6 + $0x180] sm:$0xff] }
  0x37   :  { %914 = vmatpush3.msra.mxu1 %v562_v45  ;;  %881 = vmatpush3.msra.mxu0 %v529_v44  ;;  %v152_v25 = vadd.f32 %v151_v13, %v150_v1  ;;  %v295_v26 = vrot.slane %v294_v14, 2  ;;  %v331_v27 = vrot.slane %v330_v15, 2  ;;  %v188_v29 = vadd.f32 %v187_v18, %v186_v6  ;;  %v59_v44 = vld [vmem:[#allocation3] sm:$0xff]  ;;  %v620_v45 = vld [vmem:[#allocation6 + $0x2f8] sm:$0xff]  ;;  %v65_v51 = vld [vmem:[#allocation3 + $0x30] sm:$0xff] }
  0x38   :  { %915 = vmatprep.subr.mxu1 %v577_v46  ;;  %882 = vmatprep.subr.mxu0 %v544_v47  ;;  %v224_v30 = vadd.f32 %v223_v19, %v222_v7  ;;  %v260_v31 = vadd.f32 %v259_v20, %v258_v8  ;;  %v367_v32 = vrot.slane %v366_v21, 2  ;;  %v117_v35 = vrot.slane %v116_v24, 1  ;;  %v557_v46 = vld [vmem:[#allocation6 + $0x100] sm:$0xff]  ;;  %v77_v57 = vld [vmem:[#allocation3 + $0x90] sm:$0xff] }
  0x39   :  { %916 = vmatpush3.msra.mxu1 %v561_v48  ;;  %883 = vmatpush3.msra.mxu0 %v528_v62  ;;  %v153_v36 = vrot.slane %v152_v25, 1  ;;  %v296_v37 = vadd.f32 %v295_v26, %v294_v14  ;;  %v332_v38 = vadd.f32 %v331_v27, %v330_v15  ;;  %v189_v40 = vrot.slane %v188_v29, 1  ;;  %v71_v52 = vld [vmem:[#allocation3 + $0x60] sm:$0xff]  ;;  %v89_v62 = vld [vmem:[#allocation3 + $0xf0] sm:$0xff] }
  0x3a   :  { %917 = vmatprep.subr.mxu1 %v576_v63  ;;  %884 = vmatprep.subr.mxu0 %v543_v4  ;;  %v225_v41 = vrot.slane %v224_v30, 1  ;;  %v261_v42 = vrot.slane %v260_v31, 1  ;;  %v368_v43 = vadd.f32 %v367_v32, %v366_v21  ;;  %v118_v47 = vadd.f32 %v117_v35, %v116_v24  ;;  %v83_v58 = vld [vmem:[#allocation3 + $0xc0] sm:$0xff] }
  0x3b   :  { %918 = vmatpush3.msra.mxu1 %v560_v5  ;;  %885 = vmatpush3.msra.mxu0 %v527_v10  ;;  %v154_v48 = vadd.f32 %v153_v36, %v152_v25  ;;  %v297_v49 = vrot.slane %v296_v37, 1  ;;  %v333_v50 = vrot.slane %v332_v38, 1  ;;  %v190_v53 = vadd.f32 %v189_v40, %v188_v29 }
  0x3c   :  { %919 = vmatprep.subr.mxu1 %v575_v11  ;;  %886 = vmatprep.subr.mxu0 %v542_v16  ;;  %v226_v54 = vadd.f32 %v225_v41, %v224_v30  ;;  %v262_v55 = vadd.f32 %v261_v42, %v260_v31  ;;  %v369_v56 = vrot.slane %v368_v43, 1  ;;  %v107_v63 = vrot.slane %v59_v44, 4 }
  0x3d   :  { %920 = vmatpush3.msra.mxu1 %v559_v17  ;;  %887 = vmatpush3.msra.mxu0 %v526_v22  ;;  %v298_v59 = vadd.f32 %v297_v49, %v296_v37  ;;  %v334_v60 = vadd.f32 %v333_v50, %v332_v38  ;;  %v457_v61 = vsel %vm443_vm0, %v154_v48, %v118_v47  ;;  %v143_v2 = vrot.slane %v65_v51, 4  ;;  %v95_v17 = vld [vmem:[#allocation3 + $0x120] sm:$0xff]  ;;  %v101_v22 = vld [vmem:[#allocation3 + $0x150] sm:$0xff]  ;;  %v62_v38 = vld [vmem:[#allocation3 + $0x18] sm:$0xff] }
  0x3e   :  { %921 = vmatprep.subr.mxu1 %v574_v23  ;;  %888 = vmatprep.subr.mxu0 %v541_v28  ;;  %v370_v0 = vadd.f32 %v369_v56, %v368_v43  ;;  %v458_v1 = vsel %vm445_vm1, %v190_v53, %v457_v61  ;;  %v179_v3 = vrot.slane %v71_v52, 4  ;;  %v108_v5 = vadd.f32 %v107_v63, %v59_v44  ;;  %v68_v43 = vld [vmem:[#allocation3 + $0x48] sm:$0xff]  ;;  %v74_v48 = vld [vmem:[#allocation3 + $0x78] sm:$0xff] }
  0x3f   :  { %922 = vmatpush3.msra.mxu1 %v558_v33  ;;  %889 = vmatpush3.msra.mxu0 %v525_v34  ;;  %v459_v4 = vsel %vm447_vm2, %v226_v54, %v458_v1  ;;  %v215_v6 = vrot.slane %v77_v57, 4  ;;  %v251_v7 = vrot.slane %v83_v58, 4  ;;  %v144_v9 = vadd.f32 %v143_v2, %v65_v51 }
  0x40   :  { %923 = vmatprep.subr.mxu1 %v573_v39  ;;  %928 = vmatprep.subr.mxu0 %v620_v45  ;;  %v460_v8 = vsel %vm449_vm3, %v262_v55, %v459_v4  ;;  %v180_v10 = vadd.f32 %v179_v3, %v71_v52  ;;  %v287_v11 = vrot.slane %v89_v62, 4  ;;  %v109_v13 = vrot.slane %v108_v5, 2  ;;  %v80_v52 = vld [vmem:[#allocation3 + $0xa8] sm:$0xff] }
  0x41   :  { %924 = vmatpush3.msra.mxu1 %v557_v46  ;;  %v461_v12 = vsel %vm451_vm4, %v298_v59, %v460_v8  ;;  %v216_v14 = vadd.f32 %v215_v6, %v77_v57  ;;  %v252_v15 = vadd.f32 %v251_v7, %v83_v58  ;;  %v145_v18 = vrot.slane %v144_v9, 2 }
  0x42   :  { %v462_v16 = vsel %vm453_vm5, %v334_v60, %v461_v12  ;;  %v181_v19 = vrot.slane %v180_v10, 2  ;;  %v288_v20 = vadd.f32 %v287_v11, %v89_v62  ;;  %v110_v23 = vadd.f32 %v109_v13, %v108_v5  ;;  %v92_v5 = vld [vmem:[#allocation3 + $0x108] sm:$0xff] }
  0x43   :  { %v463_v21 = vsel %vm455_vm6, %v370_v0, %v462_v16  ;;  %v217_v24 = vrot.slane %v216_v14, 2  ;;  %v253_v25 = vrot.slane %v252_v15, 2  ;;  %v146_v27 = vadd.f32 %v145_v18, %v144_v9  ;;  %v86_v0 = vld [vmem:[#allocation3 + $0xd8] sm:$0xff] }
  0x44   :  { %v520_v26 = vmul.f32 0.125, %v463_v21  ;;  %v182_v28 = vadd.f32 %v181_v19, %v180_v10  ;;  %v289_v29 = vrot.slane %v288_v20, 2  ;;  %v111_v30 = vrot.slane %v110_v23, 1  ;;  %v98_v21 = vld [vmem:[#allocation3 + $0x138] sm:$0xff] }
  0x45   :  { %v218_v31 = vadd.f32 %v217_v24, %v216_v14  ;;  %v254_v32 = vadd.f32 %v253_v25, %v252_v15  ;;  %v323_v33 = vrot.slane %v95_v17, 4  ;;  %v147_v34 = vrot.slane %v146_v27, 1 }
  0x46   :  { %692 = vmatprep.mubr.f32.mxu0 %v520_v26  ;;  %v183_v35 = vrot.slane %v182_v28, 1  ;;  %v290_v36 = vadd.f32 %v289_v29, %v288_v20  ;;  %v359_v37 = vrot.slane %v101_v22, 4  ;;  %v112_v39 = vadd.f32 %v111_v30, %v110_v23  ;;  %v104_v26 = vld [vmem:[#allocation3 + $0x168] sm:$0xff]  ;;  %v61_v30 = vld [vmem:[#allocation3 + $0x10] sm:$0xff] }
  0x47   :  { %v219_v40 = vrot.slane %v218_v31, 1  ;;  %v255_v41 = vrot.slane %v254_v32, 1  ;;  %v324_v42 = vadd.f32 %v323_v33, %v95_v17  ;;  %v148_v44 = vadd.f32 %v147_v34, %v146_v27 }
  0x48   :  { %v184_v45 = vadd.f32 %v183_v35, %v182_v28  ;;  %v291_v46 = vrot.slane %v290_v36, 1  ;;  %v360_v47 = vadd.f32 %v359_v37, %v101_v22  ;;  %v125_v53 = vrot.slane %v62_v38, 4  ;;  %v604_v35 = vld [vmem:[#allocation6 + $0x278] sm:$0xff] }
  0x49   :  { %v220_v49 = vadd.f32 %v219_v40, %v218_v31  ;;  %v256_v50 = vadd.f32 %v255_v41, %v254_v32  ;;  %v325_v51 = vrot.slane %v324_v42, 2  ;;  %v444_v56 = vsel %vm443_vm0, %v148_v44, %v112_v39  ;;  %v619_v40 = vld [vmem:[#allocation6 + $0x2f0] sm:$0xff]  ;;  %v67_v44 = vld [vmem:[#allocation3 + $0x40] sm:$0xff] }
  0x4a   :  { %v292_v54 = vadd.f32 %v291_v46, %v290_v36  ;;  %v361_v55 = vrot.slane %v360_v47, 2  ;;  %v161_v57 = vrot.slane %v68_v43, 4  ;;  %v446_v59 = vsel %vm445_vm1, %v184_v45, %v444_v56  ;;  %v603_v46 = vld [vmem:[#allocation6 + $0x270] sm:$0xff]  ;;  %v79_v56 = vld [vmem:[#allocation3 + $0xa0] sm:$0xff] }
  0x4b   :  { %v326_v58 = vadd.f32 %v325_v51, %v324_v42  ;;  %v126_v60 = vadd.f32 %v125_v53, %v62_v38  ;;  %v197_v61 = vrot.slane %v74_v48, 4  ;;  %v448_v63 = vsel %vm447_vm2, %v220_v49, %v446_v59  ;;  %v73_v51 = vld [vmem:[#allocation3 + $0x70] sm:$0xff] }
  0x4c   :  { %v362_v62 = vadd.f32 %v361_v55, %v360_v47  ;;  %v162_v1 = vadd.f32 %v161_v57, %v68_v43  ;;  %v233_v2 = vrot.slane %v80_v52, 4  ;;  %v450_v4 = vsel %vm449_vm3, %v256_v50, %v448_v63  ;;  %v617_v63 = vld [vmem:[#allocation6 + $0x2e0] sm:$0xff] }
  0x4d   :  { %v327_v3 = vrot.slane %v326_v58, 1  ;;  %v127_v6 = vrot.slane %v126_v60, 2  ;;  %v198_v7 = vadd.f32 %v197_v61, %v74_v48  ;;  %v452_v9 = vsel %vm451_vm4, %v292_v54, %v450_v4  ;;  %v601_v4 = vld [vmem:[#allocation6 + $0x260] sm:$0xff] }
  0x4e   :  { %v363_v8 = vrot.slane %v362_v62, 1  ;;  %v163_v10 = vrot.slane %v162_v1, 2  ;;  %v234_v11 = vadd.f32 %v233_v2, %v80_v52  ;;  %v269_v15 = vrot.slane %v86_v0, 4  ;;  %v618_v52 = vld [vmem:[#allocation6 + $0x2e8] sm:$0xff] }
  0x4f   :  { %v328_v12 = vadd.f32 %v327_v3, %v326_v58  ;;  %v128_v13 = vadd.f32 %v127_v6, %v126_v60  ;;  %v199_v14 = vrot.slane %v198_v7, 2  ;;  %v305_v19 = vrot.slane %v92_v5, 4  ;;  %v602_v58 = vld [vmem:[#allocation6 + $0x268] sm:$0xff] }
  0x50   :  { %v364_v16 = vadd.f32 %v363_v8, %v362_v62  ;;  %v164_v17 = vadd.f32 %v163_v10, %v162_v1  ;;  %v235_v18 = vrot.slane %v234_v11, 2  ;;  %v270_v24 = vadd.f32 %v269_v15, %v86_v0  ;;  %v616_v10 = vld [vmem:[#allocation6 + $0x2d8] sm:$0xff] }
  0x51   :  { %v454_v20 = vsel %vm453_vm5, %v328_v12, %v452_v9  ;;  %v129_v22 = vrot.slane %v128_v13, 1  ;;  %v200_v23 = vadd.f32 %v199_v14, %v198_v7  ;;  %v306_v29 = vadd.f32 %v305_v19, %v92_v5  ;;  %v85_v7 = vld [vmem:[#allocation3 + $0xd0] sm:$0xff] }
  0x52   :  { %v456_v25 = vsel %vm455_vm6, %v364_v16, %v454_v20  ;;  %v165_v27 = vrot.slane %v164_v17, 1  ;;  %v236_v28 = vadd.f32 %v235_v18, %v234_v11  ;;  %v271_v34 = vrot.slane %v270_v24, 2  ;;  %v600_v16 = vld [vmem:[#allocation6 + $0x258] sm:$0xff] }
  0x53   :  { %v519_v31 = vmul.f32 0.125, %v456_v25  ;;  %v130_v32 = vadd.f32 %v129_v22, %v128_v13  ;;  %v201_v33 = vrot.slane %v200_v23, 1  ;;  %v307_v38 = vrot.slane %v306_v29, 2  ;;  %v91_v13 = vld [vmem:[#allocation3 + $0x100] sm:$0xff] }
  0x54   :  { %v166_v36 = vadd.f32 %v165_v27, %v164_v17  ;;  %v237_v37 = vrot.slane %v236_v28, 1  ;;  %v341_v39 = vrot.slane %v98_v21, 4  ;;  %v272_v42 = vadd.f32 %v271_v34, %v270_v24 }
  0x55   :  { %693 = vmatmul.mubr.f32.vlgmr.msra.gmra.mxu0 %v519_v31  ;;  %v202_v41 = vadd.f32 %v201_v33, %v200_v23  ;;  %v377_v43 = vrot.slane %v104_v26, 4  ;;  %v119_v45 = vrot.slane %v61_v30, 4  ;;  %v308_v48 = vadd.f32 %v307_v38, %v306_v29 }
  0x56   :  { %v238_v47 = vadd.f32 %v237_v37, %v236_v28  ;;  %v342_v49 = vadd.f32 %v341_v39, %v98_v21  ;;  %v471_v50 = vsel %vm443_vm0, %v166_v36, %v130_v32  ;;  %929 = vmatpush3.msra.mxu0 %v604_v35  ;;  %v273_v53 = vrot.slane %v272_v42, 1  ;;  %v615_v21 = vld [vmem:[#allocation6 + $0x2d0] sm:$0xff]  ;;  %v614_v32 = vld [vmem:[#allocation6 + $0x2c8] sm:$0xff]  ;;  %v103_v39 = vld [vmem:[#allocation3 + $0x160] sm:$0xff] }
  0x57   :  { %v378_v54 = vadd.f32 %v377_v43, %v104_v26  ;;  %v472_v55 = vsel %vm445_vm1, %v202_v41, %v471_v50  ;;  %v120_v57 = vadd.f32 %v119_v45, %v61_v30  ;;  %930 = vmatprep.subr.mxu0 %v619_v40  ;;  %v309_v59 = vrot.slane %v308_v48, 1  ;;  %v599_v26 = vld [vmem:[#allocation6 + $0x250] sm:$0xff]  ;;  %v598_v37 = vld [vmem:[#allocation6 + $0x248] sm:$0xff]  ;;  %v613_v43 = vld [vmem:[#allocation6 + $0x2c0] sm:$0xff] }
  0x58   :  { %v343_v60 = vrot.slane %v342_v49, 2  ;;  %v473_v61 = vsel %vm447_vm2, %v238_v47, %v472_v55  ;;  %v155_v62 = vrot.slane %v67_v44, 4  ;;  %931 = vmatpush3.msra.mxu0 %v603_v46  ;;  %v274_v0 = vadd.f32 %v273_v53, %v272_v42  ;;  %v97_v28 = vld [vmem:[#allocation3 + $0x130] sm:$0xff] }
  0x59   :  { %v379_v1 = vrot.slane %v378_v54, 2  ;;  %v121_v2 = vrot.slane %v120_v57, 2  ;;  %v191_v3 = vrot.slane %v73_v51, 4  ;;  %932 = vmatprep.subr.mxu0 %v618_v52  ;;  %v310_v5 = vadd.f32 %v309_v59, %v308_v48  ;;  %v597_v48 = vld [vmem:[#allocation6 + $0x240] sm:$0xff]  ;;  %v596_v59 = vld [vmem:[#allocation6 + $0x238] sm:$0xff] }
  0x5a   :  { %v344_v6 = vadd.f32 %v343_v60, %v342_v49  ;;  %v156_v8 = vadd.f32 %v155_v62, %v67_v44  ;;  %v227_v9 = vrot.slane %v79_v56, 4  ;;  %933 = vmatpush3.msra.mxu0 %v602_v58  ;;  %v474_v12 = vsel %vm449_vm3, %v274_v0, %v473_v61  ;;  %v64_v49 = vld [vmem:[#allocation3 + $0x28] sm:$0xff]  ;;  %v70_v60 = vld [vmem:[#allocation3 + $0x58] sm:$0xff]  ;;  %v611_v0 = vld [vmem:[#allocation6 + $0x2b0] sm:$0xff] }
  0x5b   :  { %v380_v11 = vadd.f32 %v379_v1, %v378_v54  ;;  %v122_v14 = vadd.f32 %v121_v2, %v120_v57  ;;  %v192_v15 = vadd.f32 %v191_v3, %v73_v51  ;;  %934 = vmatprep.subr.mxu0 %v617_v63  ;;  %v475_v18 = vsel %vm451_vm4, %v310_v5, %v474_v12  ;;  %v612_v54 = vld [vmem:[#allocation6 + $0x2b8] sm:$0xff]  ;;  %v76_v1 = vld [vmem:[#allocation3 + $0x88] sm:$0xff] }
  0x5c   :  { %v345_v17 = vrot.slane %v344_v6, 1  ;;  %v157_v19 = vrot.slane %v156_v8, 2  ;;  %v228_v20 = vadd.f32 %v227_v9, %v79_v56  ;;  %935 = vmatpush3.msra.mxu0 %v601_v4  ;;  %v263_v25 = vrot.slane %v85_v7, 4 }
  0x5d   :  { %v381_v22 = vrot.slane %v380_v11, 1  ;;  %v123_v23 = vrot.slane %v122_v14, 1  ;;  %v193_v24 = vrot.slane %v192_v15, 2  ;;  %936 = vmatprep.subr.mxu0 %v616_v10  ;;  %v299_v31 = vrot.slane %v91_v13, 4 }
  0x5e   :  { %v346_v27 = vadd.f32 %v345_v17, %v344_v6  ;;  %v158_v29 = vadd.f32 %v157_v19, %v156_v8  ;;  %v229_v30 = vrot.slane %v228_v20, 2  ;;  %937 = vmatpush3.msra.mxu0 %v600_v16  ;;  %v264_v36 = vadd.f32 %v263_v25, %v85_v7  ;;  %v595_v7 = vld [vmem:[#allocation6 + $0x230] sm:$0xff]  ;;  %v82_v8 = vld [vmem:[#allocation3 + $0xb8] sm:$0xff]  ;;  %v594_v17 = vld [vmem:[#allocation6 + $0x228] sm:$0xff] }
  0x5f   :  { %v382_v33 = vadd.f32 %v381_v22, %v380_v11  ;;  %v124_v34 = vadd.f32 %v123_v23, %v122_v14  ;;  %v194_v35 = vadd.f32 %v193_v24, %v192_v15  ;;  %938 = vmatprep.subr.mxu0 %v615_v21  ;;  %v300_v42 = vadd.f32 %v299_v31, %v91_v13  ;;  %v610_v11 = vld [vmem:[#allocation6 + $0x2a8] sm:$0xff] }
  0x60   :  { %v476_v38 = vsel %vm453_vm5, %v346_v27, %v475_v18  ;;  %v159_v40 = vrot.slane %v158_v29, 1  ;;  %v230_v41 = vadd.f32 %v229_v30, %v228_v20  ;;  %939 = vmatpush3.msra.mxu0 %v599_v26  ;;  %v265_v46 = vrot.slane %v264_v36, 2  ;;  %v609_v20 = vld [vmem:[#allocation6 + $0x2a0] sm:$0xff]  ;;  %v88_v21 = vld [vmem:[#allocation3 + $0xe8] sm:$0xff] }
  0x61   :  { %v477_v44 = vsel %vm455_vm6, %v382_v33, %v476_v38  ;;  %v195_v45 = vrot.slane %v194_v35, 1  ;;  %v335_v47 = vrot.slane %v97_v28, 4  ;;  %940 = vmatprep.subr.mxu0 %v614_v32  ;;  %v301_v53 = vrot.slane %v300_v42, 2  ;;  %v608_v32 = vld [vmem:[#allocation6 + $0x298] sm:$0xff] }
  0x62   :  { %v522_v50 = vmul.f32 0.125, %v477_v44  ;;  %v160_v51 = vadd.f32 %v159_v40, %v158_v29  ;;  %v231_v52 = vrot.slane %v230_v41, 1  ;;  %941 = vmatpush3.msra.mxu0 %v598_v37  ;;  %v266_v56 = vadd.f32 %v265_v46, %v264_v36  ;;  %v94_v29 = vld [vmem:[#allocation3 + $0x118] sm:$0xff] }
  0x63   :  { %v196_v55 = vadd.f32 %v195_v45, %v194_v35  ;;  %v336_v57 = vadd.f32 %v335_v47, %v97_v28  ;;  %v371_v58 = vrot.slane %v103_v39, 4  ;;  %942 = vmatprep.subr.mxu0 %v613_v43  ;;  %v302_v62 = vadd.f32 %v301_v53, %v300_v42  ;;  %v593_v28 = vld [vmem:[#allocation6 + $0x220] sm:$0xff]  ;;  %v592_v38 = vld [vmem:[#allocation6 + $0x218] sm:$0xff]  ;;  %v100_v42 = vld [vmem:[#allocation3 + $0x148] sm:$0xff] }
  0x64   :  { %762 = vmatprep.mubr.f32.mxu1 %v522_v50  ;;  %v232_v61 = vadd.f32 %v231_v52, %v230_v41  ;;  %v464_v63 = vsel %vm443_vm0, %v160_v51, %v124_v34  ;;  %943 = vmatpush3.msra.mxu0 %v597_v48  ;;  %v137_v2 = vrot.slane %v64_v49, 4  ;;  %v267_v3 = vrot.slane %v266_v56, 1  ;;  %v607_v41 = vld [vmem:[#allocation6 + $0x290] sm:$0xff]  ;;  %v606_v52 = vld [vmem:[#allocation6 + $0x288] sm:$0xff]  ;;  %v106_v53 = vld [vmem:[#allocation3 + $0x178] sm:$0xff] }
  0x65   :  { %v337_v4 = vrot.slane %v336_v57, 2  ;;  %v372_v5 = vadd.f32 %v371_v58, %v103_v39  ;;  %v465_v6 = vsel %vm445_vm1, %v196_v55, %v464_v63  ;;  %944 = vmatprep.subr.mxu0 %v612_v54  ;;  %v303_v9 = vrot.slane %v302_v62, 1  ;;  %v63_v63 = vld [vmem:[#allocation3 + $0x20] sm:$0xff] }
  0x66   :  { %v466_v10 = vsel %vm447_vm2, %v232_v61, %v465_v6  ;;  %945 = vmatpush3.msra.mxu0 %v596_v59  ;;  %v138_v12 = vadd.f32 %v137_v2, %v64_v49  ;;  %v173_v13 = vrot.slane %v70_v60, 4  ;;  %v268_v14 = vadd.f32 %v267_v3, %v266_v56  ;;  %v591_v49 = vld [vmem:[#allocation6 + $0x210] sm:$0xff]  ;;  %v590_v59 = vld [vmem:[#allocation6 + $0x208] sm:$0xff] }
  0x67   :  { %v338_v15 = vadd.f32 %v337_v4, %v336_v57  ;;  %v373_v16 = vrot.slane %v372_v5, 2  ;;  %946 = vmatprep.subr.mxu0 %v611_v0  ;;  %v209_v18 = vrot.slane %v76_v1, 4  ;;  %v304_v19 = vadd.f32 %v303_v9, %v302_v62 }
  0x68   :  { %947 = vmatpush3.msra.mxu0 %v595_v7  ;;  %v139_v22 = vrot.slane %v138_v12, 2  ;;  %v174_v23 = vadd.f32 %v173_v13, %v70_v60  ;;  %v245_v24 = vrot.slane %v82_v8, 4  ;;  %v467_v27 = vsel %vm449_vm3, %v268_v14, %v466_v10  ;;  %v69_v10 = vld [vmem:[#allocation3 + $0x50] sm:$0xff]  ;;  %v75_v14 = vld [vmem:[#allocation3 + $0x80] sm:$0xff] }
  0x69   :  { %v339_v25 = vrot.slane %v338_v15, 1  ;;  %v374_v26 = vadd.f32 %v373_v16, %v372_v5  ;;  %948 = vmatprep.subr.mxu0 %v610_v11  ;;  %v210_v30 = vadd.f32 %v209_v18, %v76_v1  ;;  %v468_v31 = vsel %vm451_vm4, %v304_v19, %v467_v27  ;;  %v605_v1 = vld [vmem:[#allocation6 + $0x280] sm:$0xff] }
  0x6a   :  { %949 = vmatpush3.msra.mxu0 %v594_v17  ;;  %v140_v33 = vadd.f32 %v139_v22, %v138_v12  ;;  %v175_v34 = vrot.slane %v174_v23, 2  ;;  %v246_v35 = vadd.f32 %v245_v24, %v82_v8  ;;  %v281_v40 = vrot.slane %v88_v21, 4  ;;  %v589_v5 = vld [vmem:[#allocation6 + $0x200] sm:$0xff] }
  0x6b   :  { %v340_v36 = vadd.f32 %v339_v25, %v338_v15  ;;  %v375_v37 = vrot.slane %v374_v26, 1  ;;  %950 = vmatprep.subr.mxu0 %v609_v20  ;;  %v211_v39 = vrot.slane %v210_v30, 2  ;;  %v317_v46 = vrot.slane %v94_v29, 4  ;;  %v81_v20 = vld [vmem:[#allocation3 + $0xb0] sm:$0xff] }
  0x6c   :  { %951 = vmatpush3.msra.mxu0 %v593_v28  ;;  %v141_v43 = vrot.slane %v140_v33, 1  ;;  %v176_v44 = vadd.f32 %v175_v34, %v174_v23  ;;  %v247_v45 = vrot.slane %v246_v35, 2  ;;  %v282_v51 = vadd.f32 %v281_v40, %v88_v21 }
  0x6d   :  { %v376_v47 = vadd.f32 %v375_v37, %v374_v26  ;;  %v469_v48 = vsel %vm453_vm5, %v340_v36, %v468_v31  ;;  %952 = vmatprep.subr.mxu0 %v608_v32  ;;  %v212_v50 = vadd.f32 %v211_v39, %v210_v30  ;;  %v318_v57 = vadd.f32 %v317_v46, %v94_v29  ;;  %v87_v30 = vld [vmem:[#allocation3 + $0xe0] sm:$0xff]  ;;  %v93_v37 = vld [vmem:[#allocation3 + $0x110] sm:$0xff] }
  0x6e   :  { %953 = vmatpush3.msra.mxu0 %v592_v38  ;;  %v142_v54 = vadd.f32 %v141_v43, %v140_v33  ;;  %v177_v55 = vrot.slane %v176_v44, 1  ;;  %v248_v56 = vadd.f32 %v247_v45, %v246_v35  ;;  %v283_v61 = vrot.slane %v282_v51, 2 }
  0x6f   :  { %v470_v58 = vsel %vm455_vm6, %v376_v47, %v469_v48  ;;  %954 = vmatprep.subr.mxu0 %v607_v41  ;;  %v213_v60 = vrot.slane %v212_v50, 1  ;;  %v353_v62 = vrot.slane %v100_v42, 4  ;;  %v319_v4 = vrot.slane %v318_v57, 2  ;;  %v99_v47 = vld [vmem:[#allocation3 + $0x140] sm:$0xff] }
  0x70   :  { %v521_v0 = vmul.f32 0.125, %v470_v58  ;;  %955 = vmatpush3.msra.mxu0 %v591_v49  ;;  %v178_v2 = vadd.f32 %v177_v55, %v176_v44  ;;  %v249_v3 = vrot.slane %v248_v56, 1  ;;  %v284_v7 = vadd.f32 %v283_v61, %v282_v51 }
  0x71   :  { %956 = vmatprep.subr.mxu0 %v606_v52  ;;  %v214_v6 = vadd.f32 %v213_v60, %v212_v50  ;;  %v354_v8 = vadd.f32 %v353_v62, %v100_v42  ;;  %v389_v9 = vrot.slane %v106_v53, 4  ;;  %v320_v12 = vadd.f32 %v319_v4, %v318_v57 }
  0x72   :  { %763 = vmatmul.mubr.f32.vlgmr.msra.gmra.mxu1 %v521_v0  ;;  %957 = vmatpush3.msra.mxu0 %v590_v59  ;;  %v250_v11 = vadd.f32 %v249_v3, %v248_v56  ;;  %v485_v13 = vsel %vm443_vm0, %v178_v2, %v142_v54  ;;  %v131_v15 = vrot.slane %v63_v63, 4  ;;  %v285_v16 = vrot.slane %v284_v7, 1  ;;  %v105_v56 = vld [vmem:[#allocation3 + $0x170] sm:$0xff] }
  0x73   :  { %958 = vmatprep.subr.mxu0 %v605_v1  ;;  %v355_v17 = vrot.slane %v354_v8, 2  ;;  %v390_v18 = vadd.f32 %v389_v9, %v106_v53  ;;  %v486_v19 = vsel %vm445_vm1, %v214_v6, %v485_v13  ;;  %v321_v21 = vrot.slane %v320_v12, 1 }
  0x74   :  { %959 = vmatpush3.msra.mxu0 %v589_v5  ;;  %v487_v22 = vsel %vm447_vm2, %v250_v11, %v486_v19  ;;  %v132_v23 = vadd.f32 %v131_v15, %v63_v63  ;;  %v167_v24 = vrot.slane %v69_v10, 4  ;;  %v286_v25 = vadd.f32 %v285_v16, %v284_v7 }
  0x75   :  { %v356_v26 = vadd.f32 %v355_v17, %v354_v8  ;;  %v391_v27 = vrot.slane %v390_v18, 2  ;;  %v203_v28 = vrot.slane %v75_v14, 4  ;;  %v322_v29 = vadd.f32 %v321_v21, %v320_v12 }
  0x76   :  { %v133_v31 = vrot.slane %v132_v23, 2  ;;  %v168_v32 = vadd.f32 %v167_v24, %v69_v10  ;;  %v239_v33 = vrot.slane %v81_v20, 4  ;;  %v488_v36 = vsel %vm449_vm3, %v286_v25, %v487_v22 }
  0x77   :  { %v357_v34 = vrot.slane %v356_v26, 1  ;;  %v392_v35 = vadd.f32 %v391_v27, %v390_v18  ;;  %v204_v38 = vadd.f32 %v203_v28, %v75_v14  ;;  %v489_v39 = vsel %vm451_vm4, %v322_v29, %v488_v36  ;;  %v857_v36 = vld [vmem:[%s1123_s2] ss:$0 sm:$0xff] }
  0x78   :  { %v134_v40 = vadd.f32 %v133_v31, %v132_v23  ;;  %v169_v41 = vrot.slane %v168_v32, 2  ;;  %v240_v42 = vadd.f32 %v239_v33, %v81_v20  ;;  %v275_v46 = vrot.slane %v87_v30, 4 }
  0x79   :  { %v358_v43 = vadd.f32 %v357_v34, %v356_v26  ;;  %v393_v44 = vrot.slane %v392_v35, 1  ;;  %v205_v45 = vrot.slane %v204_v38, 2  ;;  %v311_v51 = vrot.slane %v93_v37, 4 }
  0x7a   :  { %v135_v48 = vrot.slane %v134_v40, 1  ;;  %v170_v49 = vadd.f32 %v169_v41, %v168_v32  ;;  %v241_v50 = vrot.slane %v240_v42, 2  ;;  %v276_v55 = vadd.f32 %v275_v46, %v87_v30 }
  0x7b   :  { %v394_v52 = vadd.f32 %v393_v44, %v392_v35  ;;  %v490_v53 = vsel %vm453_vm5, %v358_v43, %v489_v39  ;;  %v206_v54 = vadd.f32 %v205_v45, %v204_v38  ;;  %v312_v60 = vadd.f32 %v311_v51, %v93_v37 }
  0x7c   :  { %v136_v57 = vadd.f32 %v135_v48, %v134_v40  ;;  %v171_v58 = vrot.slane %v170_v49, 1  ;;  %v242_v59 = vadd.f32 %v241_v50, %v240_v42  ;;  %v277_v63 = vrot.slane %v276_v55, 2 }
  0x7d   :  { %v491_v61 = vsel %vm455_vm6, %v394_v52, %v490_v53  ;;  %v207_v62 = vrot.slane %v206_v54, 1  ;;  %v347_v0 = vrot.slane %v99_v47, 4  ;;  %v313_v4 = vrot.slane %v312_v60, 2 }
  0x7e   :  { %v524_v1 = vmul.f32 0.125, %v491_v61  ;;  %v172_v2 = vadd.f32 %v171_v58, %v170_v49  ;;  %v243_v3 = vrot.slane %v242_v59, 1  ;;  %v278_v6 = vadd.f32 %v277_v63, %v276_v55 }
  0x7f   :  { %v208_v5 = vadd.f32 %v207_v62, %v206_v54  ;;  %v348_v7 = vadd.f32 %v347_v0, %v99_v47  ;;  %v383_v8 = vrot.slane %v105_v56, 4  ;;  %v314_v10 = vadd.f32 %v313_v4, %v312_v60 }
  0x80   :  { %832 = vmatprep.mubr.f32.mxu0 %v524_v1  ;;  %v244_v9 = vadd.f32 %v243_v3, %v242_v59  ;;  %v478_v11 = vsel %vm443_vm0, %v172_v2, %v136_v57  ;;  %v279_v12 = vrot.slane %v278_v6, 1 }
  0x81   :  { %v349_v13 = vrot.slane %v348_v7, 2  ;;  %v384_v14 = vadd.f32 %v383_v8, %v105_v56  ;;  %v479_v15 = vsel %vm445_vm1, %v208_v5, %v478_v11  ;;  %v315_v16 = vrot.slane %v314_v10, 1 }
  0x82   :  { %v480_v17 = vsel %vm447_vm2, %v244_v9, %v479_v15  ;;  %v280_v18 = vadd.f32 %v279_v12, %v278_v6 }
  0x83   :  { %v350_v19 = vadd.f32 %v349_v13, %v348_v7  ;;  %v385_v20 = vrot.slane %v384_v14, 2  ;;  %v316_v21 = vadd.f32 %v315_v16, %v314_v10 }
  0x84   :  { %v481_v24 = vsel %vm449_vm3, %v280_v18, %v480_v17 }
  0x85   :  { %v351_v22 = vrot.slane %v350_v19, 1  ;;  %v386_v23 = vadd.f32 %v385_v20, %v384_v14  ;;  %v482_v25 = vsel %vm451_vm4, %v316_v21, %v481_v24 }
  0x87   :  { %v352_v26 = vadd.f32 %v351_v22, %v350_v19  ;;  %v387_v27 = vrot.slane %v386_v23, 1 }
  0x89   :  { %v388_v28 = vadd.f32 %v387_v27, %v386_v23  ;;  %v483_v29 = vsel %vm453_vm5, %v352_v26, %v482_v25 }
  0x8b   :  { %v484_v30 = vsel %vm455_vm6, %v388_v28, %v483_v29 }
  0x8c   :  { %v523_v31 = vmul.f32 0.125, %v484_v30 }
  0x8e   :  { %833 = vmatmul.mubr.f32.vlgmr.msra.gmra.mxu0 %v523_v31 }
 0x115   :  { %v890_v32 = vpop.f32.mrf.mxu0 }
 0x117   :  { %v891_v33 = vpop.f32.mrf.mxu0 }
 0x118   :  { %v892_v35 = vadd.f32 %v891_v33, %v890_v32 }
 0x11a   :  { %v695_v38 = vadd.f32 %v892_v35, %v857_v36 }
 0x132   :  { %v925_v34 = vpop.f32.mrf.mxu1 }
 0x134   :  { %v926_v37 = vpop.f32.mrf.mxu1 }
 0x135   :  { %v927_v39 = vadd.f32 %v926_v37, %v925_v34 }
 0x137   :  { %v765_v42 = vadd.f32 %v927_v39, %v695_v38 }
 0x14e   :  { %v960_v40 = vpop.f32.mrf.mxu0 }
 0x150   :  { %v961_v41 = vpop.f32.mrf.mxu0 }
 0x151   :  { %v962_v43 = vadd.f32 %v961_v41, %v960_v40 }
 0x153   :  { %v835_v44 = vadd.f32 %v962_v43, %v765_v42 }
 0x155   :  { %838 = vst [vmem:[#allocation8] sm:$0xff] %v835_v44 }
 0x156   :  { %843 = vsyncadd [#allocation5], 96  ;;  %s1044_s27 = smov [#allocation8]  }
 0x157   :  { %s844_s28 = sshll.u32 %s1044_s27, 4  ;;  %s845_s28 = int_to_ptr.vmem [resolvable:$true] %s844_s28 }
 0x158   :  { %s1012_s29 = scalar_lea.vmem %s845_s28, 32  ;;  %s1016_s30 = scalar_lea.vmem %s845_s28, 128 }
 0x159   :  { %p1013_p10 = scmp.ne.s32.totalorder %s845_s28, %s1012_s29  ;;  %p1017_p11 = scmp.lt.s32.totalorder %s845_s28, %s845_s28 }
 0x15a   :  { %p1018_p12 = scmp.lt.s32.totalorder %s1016_s30, %s1012_s29 }
 0x15c   :  { %p1019_p13 = por %p1018_p12, %p1017_p11 }
 0x15e   :  { %p1020_p0 = pnand %p1019_p13, %p1013_p10 }
 0x160   :  { %1023 = shalt.err (!%p1020_p0)
}
 0x161   :  { %s1045_s2 = smov 32   ;;  %s1046_s4 = smov 2  }
 0x162   :  { %850 = dma.vmem_to_hbm [thread:$0]  %s845_s28, 32, %s1124_s3, [#allocation5], %s1045_s2, %s1045_s2, %s1046_s4  }
 0x163   :  { %1036 = dma.done.wait [#allocation5], 128  }
 0x164   :  { %1037 = vsyncadd [#allocation5], 4294967168 }
 0x165   :  { %854 = vsyncpa [#allocation4], 1 }
 0x166   :  { %855 = vsyncpa [#allocation7], 1 }
 0x167   :  { %856 = vsyncpa [#allocation5], 1 }

</bundles_post_ra>
